<compile_context>
chip_gen: v6e
topology: v6e:2x2x1
jax: 0.10.0
libtpu: 0.0.40
codegen_flags: <defaults>
</compile_context>

<pallas_src>
import jax
import jax.numpy as jnp
from jax.experimental import pallas as pl
from jax.experimental.pallas import tpu as pltpu

_VPU_CHANNEL_THRESHOLD = 32  # below this, skip the MXU entirely


def _residual_block_kernel_vpu(x_ref, w_ref, b_ref, o_ref):
    # x_ref: (1, C, TILE_S) VMEM   channels on sublanes, spatial on lanes
    # w_ref: (C, C)  SMEM          conv weight, w[o, c]
    # b_ref: (C,)    SMEM          conv bias
    # o_ref: (1, C, TILE_S) VMEM
    x = x_ref[0].astype(jnp.float32)          # (C, TILE_S)
    C = x.shape[0]
    rows = []
    for o in range(C):                        # unrolled at trace time (tiny C)
        acc = x[0:1, :] * w_ref[o, 0]
        for c in range(1, C):
            acc = acc + x[c:c + 1, :] * w_ref[o, c]
        acc = jnp.maximum(acc + b_ref[o], 0.0)          # bias + ReLU
        rows.append(acc + x[o:o + 1, :])                # + identity shortcut
    o_ref[0] = jnp.concatenate(rows, axis=0).astype(o_ref.dtype)


def _residual_block_kernel_mxu(x_ref, w_ref, b_ref, o_ref):
    # x_ref: (1, C, TILE_S) VMEM; w_ref: (C, C) VMEM; b_ref: (C, 1) VMEM
    x = x_ref[0]                                         # (C, TILE_S)
    y = jax.lax.dot_general(                             # (C,C) @ (C,TILE_S) on MXU
        w_ref[...], x, (((1,), (0,)), ((), ())),
        preferred_element_type=jnp.float32)
    y = jnp.maximum(y + b_ref[...].astype(jnp.float32), 0.0)   # bias + ReLU
    o_ref[0] = (y + x.astype(jnp.float32)).astype(o_ref.dtype)  # + shortcut


def residual_block(x_nchw, w_conv, b_conv, *, vmem_budget_bytes=32 * 1024 * 1024):
    """ResidualBlock with main = 1x1 conv + ReLU, shortcut = pre_norm = Identity.

    x_nchw: (N, C, H, W); w_conv: (C_out=C, C_in=C); b_conv: (C,)
    """
    N, C, H, W = x_nchw.shape
    S = H * W
    x_flat = x_nchw.reshape(N, C, S)          # free reshape, stays NCHW-contiguous
    itemsize = x_nchw.dtype.itemsize

    # Largest spatial tile (multiple of 128 lanes) whose double-buffered
    # in+out copies fit the VMEM budget.
    max_tile_elems = max(128, vmem_budget_bytes // (4 * C * itemsize))
    max_tile_s = max(128, (max_tile_elems // 128) * 128)
    if S <= max_tile_s:
        tile_s = S                            # full extent: always a legal block
        grid_s = 1
    else:
        tile_s = max_tile_s                   # multiple of 128; tail block masked
        grid_s = pl.cdiv(S, tile_s)

    tile_bytes = C * tile_s * itemsize
    vmem_limit = int(min(48 * 1024 * 1024, max(4 * 1024 * 1024,
                                               5 * tile_bytes + (1 << 20))))

    use_mxu = C >= _VPU_CHANNEL_THRESHOLD
    if use_mxu:
        kernel = _residual_block_kernel_mxu
        w_arg = w_conv                                       # (C, C) in VMEM
        b_arg = b_conv.reshape(C, 1)                         # (C, 1) in VMEM
        w_spec = pl.BlockSpec((C, C), lambda n, s: (0, 0))
        b_spec = pl.BlockSpec((C, 1), lambda n, s: (0, 0))
    else:
        kernel = _residual_block_kernel_vpu
        w_arg = w_conv                                       # (C, C) in SMEM
        b_arg = b_conv                                       # (C,)   in SMEM
        w_spec = pl.BlockSpec(memory_space=pltpu.MemorySpace.SMEM)
        b_spec = pl.BlockSpec(memory_space=pltpu.MemorySpace.SMEM)

    out_flat = pl.pallas_call(
        kernel,
        out_shape=jax.ShapeDtypeStruct((N, C, S), x_nchw.dtype),
        grid_spec=pltpu.PrefetchScalarGridSpec(
            num_scalar_prefetch=0,
            grid=(N, grid_s),
            in_specs=[
                pl.BlockSpec((1, C, tile_s), lambda n, s: (n, 0, s)),  # activations
                w_spec,                                                # weight (resident)
                b_spec,                                                # bias (resident)
            ],
            out_specs=pl.BlockSpec((1, C, tile_s), lambda n, s: (n, 0, s)),
        ),
        compiler_params=pltpu.CompilerParams(
            dimension_semantics=("parallel", "parallel"),
            vmem_limit_bytes=vmem_limit,
        ),
        input_output_aliases={0: 0},   # out block depends only on same in block
    )(x_flat, w_arg, b_arg)

    return out_flat.reshape(N, C, H, W)


if __name__ == "__main__":
    key = jax.random.PRNGKey(0)
    kx, kw, kb = jax.random.split(key, 3)

    N, C, H, W = 2, 4, 16, 16
    x = jax.random.normal(kx, (N, C, H, W), dtype=jnp.float32)
    w_conv = jax.random.normal(kw, (C, C), dtype=jnp.float32) * 0.1   # Conv2d(C, C, 1)
    b_conv = jax.random.normal(kb, (C,), dtype=jnp.float32) * 0.1     # Conv2d bias

    out = residual_block(x, w_conv, b_conv)
    out = jax.block_until_ready(out)

    # Pure-JAX reference (1x1 conv + ReLU main branch, identity shortcut), NCHW.
    y = jnp.einsum("oc,nchw->nohw", w_conv, x) + b_conv[None, :, None, None]
    ref = jnp.maximum(y, 0.0) + x

    assert out.shape == (N, C, H, W)
    assert jnp.allclose(out, ref, atol=1e-5, rtol=1e-5)

    print("KERNEL_OK")
</pallas_src>

<mosaic_0001>
module attributes {stable_mosaic.version = 11 : i64} {
  func.func @_residual_block_kernel_vpu(%arg0: i32, %arg1: i32, %arg2: memref<1x4x256xf32, #tpu.memory_space<vmem>>, %arg3: memref<4x4xf32, #tpu.memory_space<smem>>, %arg4: memref<4xf32, #tpu.memory_space<smem>>, %arg5: memref<1x4x256xf32, #tpu.memory_space<vmem>>) attributes {dimension_semantics = [#tpu.dimension_semantics<parallel>, #tpu.dimension_semantics<parallel>], iteration_bounds = array<i64: 2, 1>, scalar_prefetch = 0 : i64, scratch_operands = 0 : i64, tpu.core_type = #tpu.core_type<tc>, window_params = [{transform_indices = @transform_0, window_bounds = array<i64: 1, 4, 256>}, {transform_indices = @transform_1, window_bounds = array<i64: 4, 4>}, {transform_indices = @transform_2, window_bounds = array<i64: 4>}, {transform_indices = @transform_3, window_bounds = array<i64: 1, 4, 256>}]} {
    %c0 = arith.constant 0 : index
    %c0_0 = arith.constant 0 : index
    %c0_1 = arith.constant 0 : index
    %0 = vector.load %arg2[%c0, %c0_0, %c0_1] : memref<1x4x256xf32, #tpu.memory_space<vmem>>, vector<1x4x256xf32>
    %1 = vector.shape_cast %0 : vector<1x4x256xf32> to vector<4x256xf32>
    %2 = vector.extract_strided_slice %1 {offsets = [0, 0], sizes = [1, 256], strides = [1, 1]} : vector<4x256xf32> to vector<1x256xf32>
    %c0_2 = arith.constant 0 : index
    %c0_3 = arith.constant 0 : index
    %3 = memref.load %arg3[%c0_2, %c0_3] : memref<4x4xf32, #tpu.memory_space<smem>>
    %4 = vector.broadcast %3 : f32 to vector<1x256xf32>
    %5 = arith.mulf %2, %4 : vector<1x256xf32>
    %6 = vector.extract_strided_slice %1 {offsets = [1, 0], sizes = [1, 256], strides = [1, 1]} : vector<4x256xf32> to vector<1x256xf32>
    %c0_4 = arith.constant 0 : index
    %c1 = arith.constant 1 : index
    %7 = memref.load %arg3[%c0_4, %c1] : memref<4x4xf32, #tpu.memory_space<smem>>
    %8 = vector.broadcast %7 : f32 to vector<1x256xf32>
    %9 = arith.mulf %6, %8 : vector<1x256xf32>
    %10 = arith.addf %5, %9 : vector<1x256xf32>
    %11 = vector.extract_strided_slice %1 {offsets = [2, 0], sizes = [1, 256], strides = [1, 1]} : vector<4x256xf32> to vector<1x256xf32>
    %c0_5 = arith.constant 0 : index
    %c2 = arith.constant 2 : index
    %12 = memref.load %arg3[%c0_5, %c2] : memref<4x4xf32, #tpu.memory_space<smem>>
    %13 = vector.broadcast %12 : f32 to vector<1x256xf32>
    %14 = arith.mulf %11, %13 : vector<1x256xf32>
    %15 = arith.addf %10, %14 : vector<1x256xf32>
    %16 = vector.extract_strided_slice %1 {offsets = [3, 0], sizes = [1, 256], strides = [1, 1]} : vector<4x256xf32> to vector<1x256xf32>
    %c0_6 = arith.constant 0 : index
    %c3 = arith.constant 3 : index
    %17 = memref.load %arg3[%c0_6, %c3] : memref<4x4xf32, #tpu.memory_space<smem>>
    %18 = vector.broadcast %17 : f32 to vector<1x256xf32>
    %19 = arith.mulf %16, %18 : vector<1x256xf32>
    %20 = arith.addf %15, %19 : vector<1x256xf32>
    %c0_7 = arith.constant 0 : index
    %21 = memref.load %arg4[%c0_7] : memref<4xf32, #tpu.memory_space<smem>>
    %22 = vector.broadcast %21 : f32 to vector<1x256xf32>
    %23 = arith.addf %20, %22 : vector<1x256xf32>
    %cst = arith.constant 0.000000e+00 : f32
    %24 = vector.broadcast %cst : f32 to vector<1x256xf32>
    %25 = arith.maximumf %23, %24 : vector<1x256xf32>
    %26 = vector.extract_strided_slice %1 {offsets = [0, 0], sizes = [1, 256], strides = [1, 1]} : vector<4x256xf32> to vector<1x256xf32>
    %27 = arith.addf %25, %26 : vector<1x256xf32>
    %28 = vector.extract_strided_slice %1 {offsets = [0, 0], sizes = [1, 256], strides = [1, 1]} : vector<4x256xf32> to vector<1x256xf32>
    %c1_8 = arith.constant 1 : index
    %c0_9 = arith.constant 0 : index
    %29 = memref.load %arg3[%c1_8, %c0_9] : memref<4x4xf32, #tpu.memory_space<smem>>
    %30 = vector.broadcast %29 : f32 to vector<1x256xf32>
    %31 = arith.mulf %28, %30 : vector<1x256xf32>
    %32 = vector.extract_strided_slice %1 {offsets = [1, 0], sizes = [1, 256], strides = [1, 1]} : vector<4x256xf32> to vector<1x256xf32>
    %c1_10 = arith.constant 1 : index
    %c1_11 = arith.constant 1 : index
    %33 = memref.load %arg3[%c1_10, %c1_11] : memref<4x4xf32, #tpu.memory_space<smem>>
    %34 = vector.broadcast %33 : f32 to vector<1x256xf32>
    %35 = arith.mulf %32, %34 : vector<1x256xf32>
    %36 = arith.addf %31, %35 : vector<1x256xf32>
    %37 = vector.extract_strided_slice %1 {offsets = [2, 0], sizes = [1, 256], strides = [1, 1]} : vector<4x256xf32> to vector<1x256xf32>
    %c1_12 = arith.constant 1 : index
    %c2_13 = arith.constant 2 : index
    %38 = memref.load %arg3[%c1_12, %c2_13] : memref<4x4xf32, #tpu.memory_space<smem>>
    %39 = vector.broadcast %38 : f32 to vector<1x256xf32>
    %40 = arith.mulf %37, %39 : vector<1x256xf32>
    %41 = arith.addf %36, %40 : vector<1x256xf32>
    %42 = vector.extract_strided_slice %1 {offsets = [3, 0], sizes = [1, 256], strides = [1, 1]} : vector<4x256xf32> to vector<1x256xf32>
    %c1_14 = arith.constant 1 : index
    %c3_15 = arith.constant 3 : index
    %43 = memref.load %arg3[%c1_14, %c3_15] : memref<4x4xf32, #tpu.memory_space<smem>>
    %44 = vector.broadcast %43 : f32 to vector<1x256xf32>
    %45 = arith.mulf %42, %44 : vector<1x256xf32>
    %46 = arith.addf %41, %45 : vector<1x256xf32>
    %c1_16 = arith.constant 1 : index
    %47 = memref.load %arg4[%c1_16] : memref<4xf32, #tpu.memory_space<smem>>
    %48 = vector.broadcast %47 : f32 to vector<1x256xf32>
    %49 = arith.addf %46, %48 : vector<1x256xf32>
    %cst_17 = arith.constant 0.000000e+00 : f32
    %50 = vector.broadcast %cst_17 : f32 to vector<1x256xf32>
    %51 = arith.maximumf %49, %50 : vector<1x256xf32>
    %52 = vector.extract_strided_slice %1 {offsets = [1, 0], sizes = [1, 256], strides = [1, 1]} : vector<4x256xf32> to vector<1x256xf32>
    %53 = arith.addf %51, %52 : vector<1x256xf32>
    %54 = vector.extract_strided_slice %1 {offsets = [0, 0], sizes = [1, 256], strides = [1, 1]} : vector<4x256xf32> to vector<1x256xf32>
    %c2_18 = arith.constant 2 : index
    %c0_19 = arith.constant 0 : index
    %55 = memref.load %arg3[%c2_18, %c0_19] : memref<4x4xf32, #tpu.memory_space<smem>>
    %56 = vector.broadcast %55 : f32 to vector<1x256xf32>
    %57 = arith.mulf %54, %56 : vector<1x256xf32>
    %58 = vector.extract_strided_slice %1 {offsets = [1, 0], sizes = [1, 256], strides = [1, 1]} : vector<4x256xf32> to vector<1x256xf32>
    %c2_20 = arith.constant 2 : index
    %c1_21 = arith.constant 1 : index
    %59 = memref.load %arg3[%c2_20, %c1_21] : memref<4x4xf32, #tpu.memory_space<smem>>
    %60 = vector.broadcast %59 : f32 to vector<1x256xf32>
    %61 = arith.mulf %58, %60 : vector<1x256xf32>
    %62 = arith.addf %57, %61 : vector<1x256xf32>
    %63 = vector.extract_strided_slice %1 {offsets = [2, 0], sizes = [1, 256], strides = [1, 1]} : vector<4x256xf32> to vector<1x256xf32>
    %c2_22 = arith.constant 2 : index
    %c2_23 = arith.constant 2 : index
    %64 = memref.load %arg3[%c2_22, %c2_23] : memref<4x4xf32, #tpu.memory_space<smem>>
    %65 = vector.broadcast %64 : f32 to vector<1x256xf32>
    %66 = arith.mulf %63, %65 : vector<1x256xf32>
    %67 = arith.addf %62, %66 : vector<1x256xf32>
    %68 = vector.extract_strided_slice %1 {offsets = [3, 0], sizes = [1, 256], strides = [1, 1]} : vector<4x256xf32> to vector<1x256xf32>
    %c2_24 = arith.constant 2 : index
    %c3_25 = arith.constant 3 : index
    %69 = memref.load %arg3[%c2_24, %c3_25] : memref<4x4xf32, #tpu.memory_space<smem>>
    %70 = vector.broadcast %69 : f32 to vector<1x256xf32>
    %71 = arith.mulf %68, %70 : vector<1x256xf32>
    %72 = arith.addf %67, %71 : vector<1x256xf32>
    %c2_26 = arith.constant 2 : index
    %73 = memref.load %arg4[%c2_26] : memref<4xf32, #tpu.memory_space<smem>>
    %74 = vector.broadcast %73 : f32 to vector<1x256xf32>
    %75 = arith.addf %72, %74 : vector<1x256xf32>
    %cst_27 = arith.constant 0.000000e+00 : f32
    %76 = vector.broadcast %cst_27 : f32 to vector<1x256xf32>
    %77 = arith.maximumf %75, %76 : vector<1x256xf32>
    %78 = vector.extract_strided_slice %1 {offsets = [2, 0], sizes = [1, 256], strides = [1, 1]} : vector<4x256xf32> to vector<1x256xf32>
    %79 = arith.addf %77, %78 : vector<1x256xf32>
    %80 = vector.extract_strided_slice %1 {offsets = [0, 0], sizes = [1, 256], strides = [1, 1]} : vector<4x256xf32> to vector<1x256xf32>
    %c3_28 = arith.constant 3 : index
    %c0_29 = arith.constant 0 : index
    %81 = memref.load %arg3[%c3_28, %c0_29] : memref<4x4xf32, #tpu.memory_space<smem>>
    %82 = vector.broadcast %81 : f32 to vector<1x256xf32>
    %83 = arith.mulf %80, %82 : vector<1x256xf32>
    %84 = vector.extract_strided_slice %1 {offsets = [1, 0], sizes = [1, 256], strides = [1, 1]} : vector<4x256xf32> to vector<1x256xf32>
    %c3_30 = arith.constant 3 : index
    %c1_31 = arith.constant 1 : index
    %85 = memref.load %arg3[%c3_30, %c1_31] : memref<4x4xf32, #tpu.memory_space<smem>>
    %86 = vector.broadcast %85 : f32 to vector<1x256xf32>
    %87 = arith.mulf %84, %86 : vector<1x256xf32>
    %88 = arith.addf %83, %87 : vector<1x256xf32>
    %89 = vector.extract_strided_slice %1 {offsets = [2, 0], sizes = [1, 256], strides = [1, 1]} : vector<4x256xf32> to vector<1x256xf32>
    %c3_32 = arith.constant 3 : index
    %c2_33 = arith.constant 2 : index
    %90 = memref.load %arg3[%c3_32, %c2_33] : memref<4x4xf32, #tpu.memory_space<smem>>
    %91 = vector.broadcast %90 : f32 to vector<1x256xf32>
    %92 = arith.mulf %89, %91 : vector<1x256xf32>
    %93 = arith.addf %88, %92 : vector<1x256xf32>
    %94 = vector.extract_strided_slice %1 {offsets = [3, 0], sizes = [1, 256], strides = [1, 1]} : vector<4x256xf32> to vector<1x256xf32>
    %c3_34 = arith.constant 3 : index
    %c3_35 = arith.constant 3 : index
    %95 = memref.load %arg3[%c3_34, %c3_35] : memref<4x4xf32, #tpu.memory_space<smem>>
    %96 = vector.broadcast %95 : f32 to vector<1x256xf32>
    %97 = arith.mulf %94, %96 : vector<1x256xf32>
    %98 = arith.addf %93, %97 : vector<1x256xf32>
    %c3_36 = arith.constant 3 : index
    %99 = memref.load %arg4[%c3_36] : memref<4xf32, #tpu.memory_space<smem>>
    %100 = vector.broadcast %99 : f32 to vector<1x256xf32>
    %101 = arith.addf %98, %100 : vector<1x256xf32>
    %cst_37 = arith.constant 0.000000e+00 : f32
    %102 = vector.broadcast %cst_37 : f32 to vector<1x256xf32>
    %103 = arith.maximumf %101, %102 : vector<1x256xf32>
    %104 = vector.extract_strided_slice %1 {offsets = [3, 0], sizes = [1, 256], strides = [1, 1]} : vector<4x256xf32> to vector<1x256xf32>
    %105 = arith.addf %103, %104 : vector<1x256xf32>
    %106 = tpu.concatenate %27, %53, %79, %105 in 0 : vector<1x256xf32>, vector<1x256xf32>, vector<1x256xf32>, vector<1x256xf32> -> vector<4x256xf32>
    %c0_38 = arith.constant 0 : index
    %c0_39 = arith.constant 0 : index
    %c0_40 = arith.constant 0 : index
    %107 = vector.load %arg5[%c0_38, %c0_39, %c0_40] : memref<1x4x256xf32, #tpu.memory_space<vmem>>, vector<1x4x256xf32>
    %108 = vector.shape_cast %107 : vector<1x4x256xf32> to vector<4x256xf32>
    %109 = vector.shape_cast %106 : vector<4x256xf32> to vector<1x4x256xf32>
    tpu.vector_store %arg5[%c0_38, %c0_39, %c0_40], %109 {strides = array<i32>} : memref<1x4x256xf32, #tpu.memory_space<vmem>>, vector<1x4x256xf32>,
    return
  }
  func.func @transform_0(%arg0: i32, %arg1: i32) -> (i32, i32, i32) {
    %c0_i32 = arith.constant 0 : i32
    %c0_i32_0 = arith.constant 0 : i32
    return %arg0, %c0_i32, %arg1 : i32, i32, i32
  }
  func.func @transform_1(%arg0: i32, %arg1: i32) -> (i32, i32) {
    %c0_i32 = arith.constant 0 : i32
    %c0_i32_0 = arith.constant 0 : i32
    %c0_i32_1 = arith.constant 0 : i32
    return %c0_i32, %c0_i32_0 : i32, i32
  }
  func.func @transform_2(%arg0: i32, %arg1: i32) -> i32 {
    %c0_i32 = arith.constant 0 : i32
    %c0_i32_0 = arith.constant 0 : i32
    return %c0_i32 : i32
  }
  func.func @transform_3(%arg0: i32, %arg1: i32) -> (i32, i32, i32) {
    %c0_i32 = arith.constant 0 : i32
    %c0_i32_0 = arith.constant 0 : i32
    return %arg0, %c0_i32, %arg1 : i32, i32, i32
  }
}

</mosaic_0001>

<bundles_post_ra>
// kernel: tpu_custom_call.1
= control target key start
LH: loop header
LB: loop body
LE: loop exit
PB: predicated region body
PF: predicated region fallthrough
CT: control target
= control target key end

     0   :  { %8 = vsyncpa [#allocation3], 0  ;;  %s1079_s0 = inlined_call_operand.hbm [shape: f32[2,4,256], index: 0, kind: input, shape index: {}, may-alias: {0,3}]   ;;  %s1080_s1 = inlined_call_operand.vmem [shape: f32[4,4], index: 1, kind: input, shape index: {}]   ;;  %s1081_s2 = inlined_call_operand.vmem [shape: f32[4], index: 2, kind: input, shape index: {}]   ;;  %s1082_s3 = inlined_call_operand.hbm [shape: f32[2,4,256], index: 3, kind: output, shape index: {}, may-alias: {0,3}]  }
   0x1   :  { %10 = vsyncpa [#allocation3 + $0x1], 0 }
   0x2   :  { %11 = vsyncpa [#allocation5], 0 }
   0x3   :  { %12 = vsyncpa [#allocation8], 0 }
   0x4   :  { %13 = vsyncpa [#allocation4], 0 }
   0x5   :  { %15 = vsyncpa [#allocation4 + $0x1], 0  ;;  %s863_s12 = smov 0   ;;  %s865_s13 = smov 0  }
   0x6   :  { %s867_s14 = smov 0   ;;  %s869_s15 = smov 0  }
   0x7   :  { %s871_s16 = smov 0   ;;  %s873_s17 = smov 0  }
   0x8 LB: > { %s554_s18 = sadd.s32 4294967295, %s837_s17   ;;  %s555_s19 = sadd.s32 4294967294, %s837_s17   ;;  %s837_s17 = sphi %s873_s17, %s21_s17   ;;  %s833_s16 = sphi %s871_s16, %s1105_s16   ;;  %s829_s15 = sphi %s869_s15, %s1104_s15   ;;  %s825_s14 = sphi %s867_s14, %s1103_s14   ;;  %s821_s13 = sphi %s865_s13, %s1102_s13   ;;  %s817_s12 = sphi %s863_s12, %s1101_s12  }
   0x9   : > { %p55_p0 = scmp.ne.s32.totalorder %s821_s13, %s817_s12  ;;  %p897_p1 = scmp.eq.s32.totalorder %s554_s18, 0 }
   0xa   : > { %p901_p2 = scmp.eq.s32.totalorder %s554_s18, 1  ;;  %p129_p3 = scmp.eq.s32.totalorder %s555_s19, 1 }
   0xb   : > { %s1087_s20 = scalar_select %p897_p1, 1, 0 }
   0xc   : > { %s1088_s21 = scalar_select %p901_p2, 1, 0 }
   0xd   : > { %p907_p4 = por %p897_p1, %p55_p0  ;;  %p556_p5 = scmp.ge.s32.totalorder %s837_s17, 1 }
   0xe   : > { %p912_p6 = por %p129_p3, %p55_p0  ;;  %p136_p7 = scmp.lt.s32.totalorder %s837_s17, 3 }
   0xf   : > { %s1089_s22 = scalar_select %p907_p4, 1, 0 }
  0x10   : > { %s1090_s23 = scalar_select %p912_p6, 1, 0 }
  0x11   : > { %s149_s26 = sshll.u32 %s1080_s1, 4  ;;  %p920_p8 = pnand %p556_p5, %p136_p7  ;;  %s150_s26 = int_to_ptr.vmem [resolvable:$true] %s149_s26 }
  0x12   : > { %s160_s30 = sshll.u32 %s1081_s2, 4  ;;  %s691_s5 = scalar_lea.vmem %s150_s26, 64  ;;  %s161_s30 = int_to_ptr.vmem [resolvable:$true] %s160_s30 }
  0x13   : > { %s1091_s27 = scalar_select %p920_p8, 1, 0 }
  0x14   : > { %p620_p10 = pneg %p920_p8  ;;  %p692_p12 = scmp.ne.s32.totalorder %s150_s26, %s691_s5 }
  0x15   : > { %p699_p5 = scmp.lt.s32.totalorder %s150_s26, %s150_s26  ;;  %p700_p7 = scmp.lt.s32.totalorder %s691_s5, %s691_s5 }
  0x16   : > { %p932_p11 = pnand %p620_p10, %p897_p1 }
  0x17   : > { %p701_p9 = por %p700_p7, %p699_p5 }
  0x18   : > { %p693_p13 = pneg %p932_p11 }
  0x1a   : > { %p694_p0 = pnand %p693_p13, %p692_p12 }
  0x1c   : > { %p695_p3 = pneg %p694_p0 }
  0x1e   : > { %p702_p6 = pnand %p701_p9, %p695_p3 }
  0x20   : > { %705 = shalt.err (!%p702_p6)
}
  0x21   : > { %s839_s6 = smov [#allocation6]   ;;  %s706_s7 = scalar_lea.vmem %s161_s30, 16 }
  0x22   : > { %623 = dma.vmem_to_smem (!%p932_p11), %s150_s26, 64, %s839_s6, [#allocation5]  }
  0x23   : > { %p707_p10 = scmp.ne.s32.totalorder %s161_s30, %s706_s7  ;;  %p714_p8 = scmp.lt.s32.totalorder %s161_s30, %s161_s30 }
  0x24   : > { %p715_p2 = scmp.lt.s32.totalorder %s706_s7, %s706_s7 }
  0x25   : > { %p709_p1 = pnand %p707_p10, %p693_p13 }
  0x26   : > { %p716_p12 = por %p715_p2, %p714_p8 }
  0x27   : > { %p710_p4 = pneg %p709_p1 }
  0x29   : > { %p717_p0 = pnand %p716_p12, %p710_p4 }
  0x2b   : > { %720 = shalt.err (!%p717_p0)
}
  0x2c   : > { %s840_s8 = smov [#allocation7]   ;;  %s33_s9 = sadd.s32 1, %s833_s16 }
  0x2d   : > { %626 = dma.vmem_to_smem (!%p932_p11), %s161_s30, 16, %s840_s8, [#allocation8]  }
  0x2e   : > { %s42_s10 = sadd.s32 1, %s825_s14  ;;  %p35_p1 = scmp.ge.s32.totalorder %s33_s9, 2 }
  0x2f   : > { %p49_p2 = scmp.ne.s32.totalorder %s825_s14, %s821_s13  ;;  %p50_p4 = scmp.eq.s32.totalorder %s837_s17, 0 }
  0x30   : > { %p637_p6 = scmp.lt.s32.totalorder %s837_s17, 2  ;;  %s1107_s9 = smov (%p35_p1, %s33_s9), 0 }
  0x31   : > { %p51_p8 = por %p50_p4, %p49_p2  ;;  %p1093_p9 = scmp.ne.s32.totalorder %s1088_s21, 0 }
  0x32   : > { %s37_s18 = ssub.s32 %s833_s16, %s1107_s9  ;;  %s171_s19 = sand.u32 1, %s825_s14  }
  0x33   : > { %p952_p13 = por %p1093_p9, %p49_p2  ;;  %p40_p3 = scmp.eq.s32.totalorder %s37_s18, 0 }
  0x34   : > { %s560_s24 = sshll.u32 %s171_s19, 3  ;;  %s606_s25 = sshll.u32 %s833_s16, 7 }
  0x35   : > { %s961_s26 = scalar_select %p40_p3, %s825_s14, %s42_s10  }
  0x36   : > { %s183_s30 = scalar_lea.hbm %s1079_s0, %s606_s25  ;;  %s175_s4 = scalar_lea.vmem [#allocation2], %s560_s24 }
  0x37   : > { %s185_s5 = sshll.u32 %s175_s4, 4  ;;  %p968_p11 = pnand %p637_p6, %p51_p8  ;;  %s186_s5 = int_to_ptr.vmem [resolvable:$true] %s185_s5 }
  0x38   : > { %s172_s6 = scalar_lea.sflag [#allocation3], %s171_s19  ;;  %s734_s7 = scalar_lea.vmem %s186_s5, 128 }
  0x39   : > { %p723_p5 = pneg %p968_p11  ;;  %p735_p7 = scmp.ne.s32.totalorder %s186_s5, %s734_s7 }
  0x3a   : > { %s841_s8 = smov [#allocation2]  }
  0x3b   : > { %p737_p10 = pnand %p735_p7, %p723_p5  ;;  %s739_s10 = sshll.u32 %s841_s8, 4  ;;  %s740_s10 = int_to_ptr.vmem [resolvable:$false] %s739_s10 }
  0x3c   : > { %s741_s18 = scalar_lea.vmem %s740_s10, 256  ;;  %p742_p0 = scmp.lt.s32.totalorder %s186_s5, %s740_s10 }
  0x3d   : > { %p738_p12 = pneg %p737_p10  ;;  %p743_p1 = scmp.lt.s32.totalorder %s741_s18, %s734_s7 }
  0x3f   : > { %p744_p2 = por %p743_p1, %p742_p0 }
  0x41   : > { %p745_p4 = pnand %p744_p2, %p738_p12 }
  0x43   : > { %748 = shalt.err (!%p745_p4)
}
  0x44   : > { %630 = dma.hbm_to_vmem [thread:$0]  (!%p968_p11), %s183_s30, 128, %s186_s5, %s172_s6  }
  0x45   : > { %p1096_p6 = scmp.ne.s32.totalorder %s1091_s27, 0 }
  0x46   : > { %s979_s19 = sand.u32 (!%p1096_p6), 1, %s821_s13   ;;  %p1097_p8 = scmp.ne.s32.totalorder (!%p1096_p6), %s1089_s22, 0 }
  0x47   : > { %194 = sbr.rel (%p1096_p6) target bundleno = 141 (0x8d), region = 32  ;;  %s564_s24 = sshll.u32 (!%p1096_p6), %s979_s19, 3 }
  0x48   : > { %s197_s25 = scalar_lea.sflag (!%p1096_p6), [#allocation3], %s979_s19  ;;  %s200_s28 = scalar_lea.vmem (!%p1096_p6), [#allocation2], %s564_s24 }
  0x4c   : > { %800 = dma.done.wait (%p1097_p8), %s197_s25, 128  }
  0x4d   : > { %802 = vsyncadd (%p1097_p8), %s197_s25, 4294967168  ;;  %p1098_p9 = scmp.ne.s32.totalorder %s1087_s20, 0 }
  0x4f   : > { %804 = dma.done.wait (%p1098_p9), [#allocation5], 64  }
  0x50   : > { %806 = vsyncadd (%p1098_p9), [#allocation5], 4294967232 }
  0x51   : > { %808 = dma.done.wait (%p1098_p9), [#allocation8], 16  }
  0x52   : > { %810 = vsyncadd (%p1098_p9), [#allocation8], 4294967280 }
  0x53   : > { %213 = sfence }
  0x54   : > { %s235_s27 = sld [smem:[#allocation6]]  ;;  %v999_v0 = vld [vmem:[%s200_s28] sm:$0xff]  ;;  %v374_v30 = vlaneseq  ;;  %vm417_vm0 = vcmask 1040384   ;;  %vm420_vm1 = vcmask 1041408   ;;  %vm423_vm2 = vcmask 1042432  }
  0x55   : > { %s568_s29 = sld [smem:[#allocation6 + $0x1]]  ;;  %v582_v42 = vrot.slane %v999_v0, 9 }
  0x56   : > { %s570_s30 = sld [smem:[#allocation6 + $0x2]]  ;;  %v375_v48 = vshrl.u32 %v374_v30, 7 }
  0x57   : > { %s572_s4 = sld [smem:[#allocation6 + $0x3]] }
  0x58   : > { %s997_s5 = sld [smem:[#allocation7]] }
  0x59   : > { %s574_s22 = sld [smem:[#allocation6 + $0x80]] }
  0x5a   : > { %v236_v1 = vstv %s235_s27  ;;  %s575_s21 = sld [smem:[#allocation6 + $0x81]] }
  0x5b   : > { %v239_v2 = vstv %s568_s29  ;;  %s577_s6 = sld [smem:[#allocation6 + $0x82]]  ;;  %v237_v3 = vmul.f32 %v236_v1, %v999_v0  ;;  %v591_v1 = vrot.slane %v999_v0, 10 }
  0x5c   : > { %v240_v4 = vmul.f32 %v239_v2, %v999_v0  ;;  %v247_v5 = vstv %s570_s30  ;;  %s579_s20 = sld [smem:[#allocation6 + $0x83]]  ;;  %v376_v2 = vsub.s32 0, %v375_v48 }
  0x5d   : > { %v248_v6 = vmul.f32 %v247_v5, %v999_v0  ;;  %v255_v7 = vstv %s572_s4  ;;  %s1004_s7 = sld [smem:[#allocation7 + $0x1]] }
  0x5e   : > { %v569_v8 = vrot.slane %v240_v4, 9  ;;  %v256_v9 = vmul.f32 %v255_v7, %v999_v0  ;;  %s583_s8 = sld [smem:[#allocation6 + $0x100]]  ;;  %v263_v21 = vstv %s997_s5 }
  0x5f   : > { %v571_v10 = vrot.slane %v248_v6, 10  ;;  %v268_v11 = vstv %s574_s22  ;;  %s584_s10 = sld [smem:[#allocation6 + $0x101]]  ;;  %s231_s22 = scalar_lea.vmem [#allocation9], %s564_s24 }
  0x60   : > { %v245_v12 = vadd.f32 %v569_v8, %v237_v3  ;;  %v573_v13 = vrot.slane %v256_v9, 11  ;;  %v271_v14 = vstv %s575_s21  ;;  %s586_s18 = sld [smem:[#allocation6 + $0x102]]  ;;  %v269_v15 = vmul.f32 %v268_v11, %v999_v0  ;;  %s448_s21 = sshll.u32 %s231_s22, 4  ;;  %s1034_s21 = int_to_ptr.vmem [resolvable:$true] %s448_s21 }
  0x61   : > { %v272_v16 = vmul.f32 %v271_v14, %v999_v0  ;;  %v279_v17 = vstv %s577_s6  ;;  %s588_s25 = sld [smem:[#allocation6 + $0x103]]  ;;  %v380_v3 = vsub.s32 4, %v375_v48  ;;  %s607_s6 = sshll.u32 %s829_s15, 7 }
  0x62   : > { %v253_v18 = vadd.f32 %v571_v10, %v245_v12  ;;  %v280_v19 = vmul.f32 %v279_v17, %v999_v0  ;;  %v287_v20 = vstv %s579_s20  ;;  %s1010_s28 = sld [smem:[#allocation7 + $0x2]]  ;;  %s842_s15 = smov [#allocation9]  }
  0x63   : > { %v576_v22 = vrot.slane %v272_v16, 9  ;;  %v288_v23 = vmul.f32 %v287_v20, %v999_v0  ;;  %s592_s27 = sld [smem:[#allocation6 + $0x180]]  ;;  %v295_v38 = vstv %s1004_s7  ;;  %s753_s24 = sshll.u32 %s842_s15, 4  ;;  %s754_s24 = int_to_ptr.vmem [resolvable:$false] %s753_s24 }
  0x64   : > { %v261_v24 = vadd.f32 %v573_v13, %v253_v18  ;;  %v578_v25 = vrot.slane %v280_v19, 10  ;;  %v304_v26 = vstv %s583_s8  ;;  %s1014_s29 = sld [smem:[#allocation6 + $0x181]]  ;;  %v600_v18 = vrot.slane %v999_v0, 11  ;;  %s446_s8 = scalar_lea.hbm %s1082_s3, %s607_s6 }
  0x65   : > { %v277_v27 = vadd.f32 %v576_v22, %v269_v15  ;;  %v580_v28 = vrot.slane %v288_v23, 11  ;;  %v307_v29 = vstv %s584_s10  ;;  %s595_s30 = sld [smem:[#allocation6 + $0x182]]  ;;  %v305_v32 = vmul.f32 %v304_v26, %v999_v0  ;;  %s432_s10 = scalar_lea.sflag [#allocation4], %s979_s19 }
  0x66   : > { %v264_v31 = vadd.f32 %v263_v21, %v261_v24  ;;  %v308_v33 = vmul.f32 %v307_v29, %v999_v0  ;;  %v315_v34 = vstv %s586_s18  ;;  %s597_s4 = sld [smem:[#allocation6 + $0x183]]  ;;  %s749_s18 = scalar_lea.vmem %s1034_s21, 128 }
  0x67   : > { %v285_v35 = vadd.f32 %v578_v25, %v277_v27  ;;  %v316_v36 = vmul.f32 %v315_v34, %v999_v0  ;;  %v323_v37 = vstv %s588_s25  ;;  %s599_s5 = sld [smem:[#allocation7 + $0x3]]  ;;  %p750_p3 = scmp.ne.s32.totalorder %s1034_s21, %s749_s18 }
  0x68   : > { %v585_v39 = vrot.slane %v308_v33, 9  ;;  %v324_v40 = vmul.f32 %v323_v37, %v999_v0  ;;  %v265_v45 = vmax.f32 %v264_v31, 0.0  ;;  %v331_v58 = vstv %s1010_s28  ;;  %s755_s25 = scalar_lea.vmem %s754_s24, 256  ;;  %p756_p7 = scmp.lt.s32.totalorder %s1034_s21, %s754_s24 }
  0x69   : > { %v293_v41 = vadd.f32 %v580_v28, %v285_v35  ;;  %v587_v43 = vrot.slane %v316_v36, 10  ;;  %v339_v44 = vstv %s592_s27  ;;  %p751_p11 = pnand %p750_p3, %p952_p13  ;;  %p757_p10 = scmp.lt.s32.totalorder %s755_s25, %s749_s18 }
  0x6a   : > { %v313_v46 = vadd.f32 %v585_v39, %v305_v32  ;;  %v589_v47 = vrot.slane %v324_v40, 11  ;;  %v340_v50 = vmul.f32 %v339_v44, %v999_v0  ;;  %v342_v51 = vstv %s1014_s29 }
  0x6b   : > { %v296_v49 = vadd.f32 %v295_v38, %v293_v41  ;;  %v350_v52 = vstv %s595_s30  ;;  %v343_v54 = vmul.f32 %v342_v51, %v999_v0  ;;  %v266_v63 = vadd.f32 %v265_v45, %v999_v0  ;;  %p752_p5 = pneg %p751_p11  ;;  %p758_p12 = por %p757_p10, %p756_p7 }
  0x6c   : > { %v321_v53 = vadd.f32 %v587_v43, %v313_v46  ;;  %v351_v55 = vmul.f32 %v350_v52, %v999_v0  ;;  %v358_v56 = vstv %s597_s4 }
  0x6d   : > { %v297_v57 = vmax.f32 %v296_v49, 0.0  ;;  %v359_v59 = vmul.f32 %v358_v56, %v999_v0  ;;  %v594_v61 = vrot.slane %v343_v54, 9  ;;  %v366_v10 = vstv %s599_s5  ;;  %p759_p0 = pnand %p758_p12, %p752_p5 }
  0x6e   : > { %v329_v60 = vadd.f32 %v589_v47, %v321_v53  ;;  %v596_v62 = vrot.slane %v351_v55, 10  ;;  %v377_v11 = vrot.slane %v266_v63, %v376_v2  ;;  %v381_v12 = vrot.slane %v266_v63, %v380_v3 }
  0x6f   : > { %v302_v4 = vadd.f32 %v582_v42, %v297_v57  ;;  %v348_v6 = vadd.f32 %v594_v61, %v340_v50  ;;  %v598_v7 = vrot.slane %v359_v59, 11 }
  0x70   : > { %v332_v5 = vadd.f32 %v331_v58, %v329_v60 }
  0x71   : > { %v356_v9 = vadd.f32 %v596_v62, %v348_v6  ;;  %v388_v15 = vrot.slane %v302_v4, %v376_v2  ;;  %v392_v16 = vrot.slane %v302_v4, %v380_v3 }
  0x72   : > { %v333_v8 = vmax.f32 %v332_v5, 0.0 }
  0x73   : > { %v364_v14 = vadd.f32 %v598_v7, %v356_v9  ;;  %v418_v22 = vsel %vm417_vm0, %v377_v11, %v388_v15  ;;  %v419_v23 = vsel %vm417_vm0, %v381_v12, %v392_v16 }
  0x74   : > { %v337_v13 = vadd.f32 %v591_v1, %v333_v8 }
  0x75   : > { %v367_v17 = vadd.f32 %v366_v10, %v364_v14 }
  0x76   : > { %v399_v19 = vrot.slane %v337_v13, %v376_v2  ;;  %v403_v20 = vrot.slane %v337_v13, %v380_v3 }
  0x77   : > { %v368_v21 = vmax.f32 %v367_v17, 0.0 }
  0x78   : > { %v421_v25 = vsel %vm420_vm1, %v418_v22, %v399_v19  ;;  %v422_v26 = vsel %vm420_vm1, %v419_v23, %v403_v20 }
  0x79   : > { %v372_v24 = vadd.f32 %v600_v18, %v368_v21 }
  0x7b   : > { %v410_v27 = vrot.slane %v372_v24, %v376_v2  ;;  %v414_v28 = vrot.slane %v372_v24, %v380_v3 }
  0x7d   : > { %v424_v29 = vsel %vm423_vm2, %v421_v25, %v410_v27  ;;  %v425_v0 = vsel %vm423_vm2, %v422_v26, %v414_v28 }
  0x7e   : > { %v428_v30 = vcombine.low %v424_v29, %v425_v0 }
  0x80   : > { %430 = vst [vmem:[%s231_s22] sm:$0xff] %v428_v30 }
  0x81   : > { %762 = shalt.err (!%p759_p0)
}
  0x82   : > { %s763_s28 = scalar_lea.hbm %s446_s8, 128  ;;  %s767_s29 = scalar_lea.hbm %s1082_s3, 256 }
  0x83   : > { %p764_p1 = scmp.ne.s32.totalorder %s446_s8, %s763_s28  ;;  %p768_p6 = scmp.lt.s32.totalorder %s446_s8, %s1082_s3 }
  0x84   : > { %p769_p8 = scmp.lt.s32.totalorder %s767_s29, %s763_s28 }
  0x85   : > { %p765_p2 = pnand %p764_p1, %p952_p13 }
  0x86   : > { %p770_p9 = por %p769_p8, %p768_p6 }
  0x87   : > { %p766_p4 = pneg %p765_p2 }
  0x89   : > { %p771_p3 = pnand %p770_p9, %p766_p4 }
  0x8b   : > { %774 = shalt.err (!%p771_p3)
}
  0x8c   : > { %618 = dma.vmem_to_hbm [thread:$0]  (%p952_p13), %s1034_s21, 128, %s446_s8, %s432_s10  }
  0x8d PF: > { %s460_s5 = sand.u32 1, %s817_s12   ;;  %p1099_p11 = scmp.ne.s32.totalorder %s1090_s23, 0 }
  0x8e   : > { %p1100_p5 = scmp.ge.s32.totalorder %s837_s17, 2  ;;  %s461_s22 = scalar_lea.sflag [#allocation4], %s460_s5 }
  0x90   : > { %p632_p7 = pnand %p1100_p5, %p1099_p11 }
  0x92   : > { %p633_p10 = pneg %p632_p7 }
  0x94   : > { %812 = dma.done.wait (%p633_p10), %s461_s22, 128  }
  0x95   : > { %814 = vsyncadd (%p633_p10), %s461_s22, 4294967168  ;;  %s21_s17 = sadd.s32 1, %s837_s17   ;;  %s1101_s12 = smov %s821_s13 }
  0x96   : > { %p18_p12 = scmp.ge.s32.totalorder %s21_s17, 4   ;;  %s1102_s13 = smov %s825_s14 }
  0x97   : > { %s1103_s14 = smov %s961_s26  ;;  %s1104_s15 = smov %s833_s16 }
  0x98   : > { %s1105_s16 = smov %s1107_s9  ;;  %20 = sbr.rel (!%p18_p12) target bundleno = 8 (0x8), region = 86 }
  0x9d   :  { %466 = vsyncpa [#allocation3], 1 }
  0x9e   :  { %468 = vsyncpa [#allocation3 + $0x1], 1 }
  0x9f   :  { %469 = vsyncpa [#allocation4], 1 }
  0xa0   :  { %471 = vsyncpa [#allocation4 + $0x1], 1 }
  0xa1   :  { %472 = vsyncpa [#allocation5], 1 }
  0xa2   :  { %474 = vsyncpa [#allocation5 + $0x1], 1 }
  0xa3   :  { %475 = vsyncpa [#allocation8], 1 }

</bundles_post_ra>
